<compile_context>
chip_gen: v5e
topology: v5e:2x2
jax: 0.10.0
libtpu: 0.0.40
codegen_flags: <defaults>
</compile_context>

<pallas_src>
import functools

import jax
import jax.numpy as jnp
from jax.experimental import pallas as pl
from jax.experimental.pallas import tpu as pltpu


# ----------------------------------------------------------------------------
# helpers
# ----------------------------------------------------------------------------
def _round_up(x, m):
    return pl.cdiv(x, m) * m


def _pick_divisor_tile(dim_padded, step, max_tile):
    """Largest multiple of `step` that divides `dim_padded` and is <= max_tile."""
    best = step
    d = step
    limit = min(dim_padded, max_tile)
    while d <= limit:
        if dim_padded % d == 0:
            best = d
        d += step
    return best


# ----------------------------------------------------------------------------
# Kernel: tiled linear projection, optionally with fused modality fusion
#   out = x @ W + b                         (plain)
#   out = s * a + (1 - s) * (x @ W + b)     (fused epilogue)
# ----------------------------------------------------------------------------
def _linear_kernel(x_ref, w_ref, b_ref, o_ref, acc_ref):
    k = pl.program_id(2)

    @pl.when(k == 0)
    def _():
        acc_ref[...] = jnp.zeros_like(acc_ref)

    acc_ref[...] += jnp.dot(
        x_ref[...], w_ref[...], preferred_element_type=jnp.float32
    )

    @pl.when(k == pl.num_programs(2) - 1)
    def _():
        o_ref[...] = (acc_ref[...] + b_ref[...].astype(jnp.float32)).astype(
            o_ref.dtype
        )


def _linear_fuse_kernel(x_ref, w_ref, b_ref, a_ref, o_ref, acc_ref, *, scale):
    k = pl.program_id(2)

    @pl.when(k == 0)
    def _():
        acc_ref[...] = jnp.zeros_like(acc_ref)

    acc_ref[...] += jnp.dot(
        x_ref[...], w_ref[...], preferred_element_type=jnp.float32
    )

    @pl.when(k == pl.num_programs(2) - 1)
    def _():
        v = acc_ref[...] + b_ref[...].astype(jnp.float32)
        a = a_ref[...].astype(jnp.float32)
        o_ref[...] = (scale * a + (1.0 - scale) * v).astype(o_ref.dtype)


def _pallas_linear_impl(xp, wp, bp, a_p, scale, out_dtype, tm, tk, tn):
    Mp, Kp = xp.shape
    _, Np = wp.shape
    grid = (Mp // tm, Np // tn, Kp // tk)

    in_specs = [
        pl.BlockSpec((tm, tk), lambda i, j, k: (i, k)),
        pl.BlockSpec((tk, tn), lambda i, j, k: (k, j)),
        pl.BlockSpec((1, tn), lambda i, j, k: (0, j)),
    ]
    if a_p is None:
        kernel = _linear_kernel
        args = (xp, wp, bp)
    else:
        kernel = functools.partial(_linear_fuse_kernel, scale=float(scale))
        # Block index is constant across k, so this tile is DMA'd once per
        # (i, j) output tile, not once per k step.
        in_specs.append(pl.BlockSpec((tm, tn), lambda i, j, k: (i, j)))
        args = (xp, wp, bp, a_p)

    return pl.pallas_call(
        kernel,
        out_shape=jax.ShapeDtypeStruct((Mp, Np), out_dtype),
        grid_spec=pltpu.PrefetchScalarGridSpec(
            num_scalar_prefetch=0,
            grid=grid,
            in_specs=in_specs,
            out_specs=pl.BlockSpec((tm, tn), lambda i, j, k: (i, j)),
            scratch_shapes=[pltpu.VMEM((tm, tn), jnp.float32)],
        ),
        compiler_params=pltpu.CompilerParams(
            dimension_semantics=("parallel", "parallel", "arbitrary")
        ),
    )(*args)


# ----------------------------------------------------------------------------
# Param preparation (done ONCE at load time: pad + cast the weights/bias)
# ----------------------------------------------------------------------------
def prepare_linear_params(w, b, *, compute_dtype=None):
    """w: (K, N) [x @ w, i.e. torch weight transposed], b: (N,)."""
    K, N = w.shape
    assert b.shape == (N,)
    if compute_dtype is None:
        compute_dtype = w.dtype
    Kp = _round_up(K, 128)
    Np = _round_up(N, 128)
    if (Kp, N == Np) == (K, True) and Kp == K and Np == N:
        wp = w.astype(compute_dtype)
    else:
        wp = jnp.zeros((Kp, Np), compute_dtype).at[:K, :N].set(
            w.astype(compute_dtype)
        )
    bp = jnp.zeros((1, Np), jnp.float32).at[0, :N].set(b.astype(jnp.float32))
    return {"w": wp, "b": bp, "K": K, "N": N}


# ----------------------------------------------------------------------------
# Linear projection wrapper (optionally fused with modality fusion)
# ----------------------------------------------------------------------------
def pallas_linear(
    x,
    prepared,
    *,
    a_fused=None,
    fusion_scale=0.5,
    out_dtype=None,
    max_tm=256,
    max_tk=512,
    max_tn=512,
):
    """x: (M, K) -> (M, N).  If a_fused (M, N) is given, returns
    fusion_scale * a_fused + (1 - fusion_scale) * (x @ W + b)."""
    M, K = x.shape
    assert K == prepared["K"]
    wp, bp = prepared["w"], prepared["b"]
    Kp, Np = wp.shape
    N = prepared["N"]
    compute_dtype = wp.dtype
    if out_dtype is None:
        out_dtype = x.dtype

    Mp = _round_up(M, 8)
    tm = _pick_divisor_tile(Mp, 8, max_tm)
    tk = _pick_divisor_tile(Kp, 128, max_tk)
    tn = _pick_divisor_tile(Np, 128, max_tn)

    # Pad/cast activations only when actually needed (no per-call copy on
    # aligned shapes).
    if (Mp != M) or (Kp != K) or (x.dtype != compute_dtype):
        xp = jnp.zeros((Mp, Kp), compute_dtype).at[:M, :K].set(
            x.astype(compute_dtype)
        )
    else:
        xp = x

    a_p = None
    if a_fused is not None:
        assert a_fused.shape == (M, N)
        if (Mp != M) or (Np != N):
            a_p = jnp.zeros((Mp, Np), a_fused.dtype).at[:M, :N].set(a_fused)
        else:
            a_p = a_fused

    out = _pallas_linear_impl(xp, wp, bp, a_p, fusion_scale, out_dtype, tm, tk, tn)
    if (Mp != M) or (Np != N):
        out = out[:M, :N]
    return out


# ----------------------------------------------------------------------------
# Glue: PyTorch-equivalent _pad_or_truncate (zero-pad along time, dim=1)
# ----------------------------------------------------------------------------
def pad_or_truncate(x, target_len):
    B, T, D = x.shape
    if T > target_len:
        return x[:, :target_len, :]
    if T < target_len:
        pad = jnp.zeros((B, target_len - T, D), dtype=x.dtype)
        return jnp.concatenate([x, pad], axis=1)
    return x


# ----------------------------------------------------------------------------
# Model wrapper (modality="both" path of AVHuBERTWhisperModel.forward)
# ----------------------------------------------------------------------------
def avhubert_whisper_forward(
    audio_features,   # (B, Ta, whisper_dim)  - Whisper encoder last_hidden_state
    video_features,   # (B, Tv, avhubert_dim) - AVHuBERT encoder output
    audio_params,     # prepare_linear_params(w_audio, b_audio)
    video_params,     # prepare_linear_params(w_video, b_video)
    *,
    fusion_scale=0.5,
    max_seq_len=256,
    out_dtype=None,   # e.g. jnp.bfloat16 to match the LLM input dtype
):
    B, Ta, Dw = audio_features.shape
    _, Tv, Dv = video_features.shape
    N = audio_params["N"]
    assert video_params["N"] == N
    if out_dtype is None:
        out_dtype = audio_features.dtype

    # 1) audio_projection (nn.Linear) -> tiled MXU matmul.
    a_proj = pallas_linear(
        audio_features.reshape(B * Ta, Dw), audio_params, out_dtype=out_dtype
    ).reshape(B, Ta, N)

    # 2) pad audio stream to the common time length (zeros, like torch.cat pad).
    max_len = max(Ta, Tv)
    a_proj = pad_or_truncate(a_proj, max_len)

    # 3) video_projection fused with the modality fusion in its epilogue over
    #    the Tv time steps where the video stream has real data.
    fused_head = pallas_linear(
        video_features.reshape(B * Tv, Dv),
        video_params,
        a_fused=a_proj[:, :Tv, :].reshape(B * Tv, N),
        fusion_scale=fusion_scale,
        out_dtype=out_dtype,
    ).reshape(B, Tv, N)

    if max_len > Tv:
        # Video is zero-padded beyond Tv, so fused = fusion_scale * a_proj there.
        fused_tail = (
            fusion_scale * a_proj[:, Tv:, :].astype(jnp.float32)
        ).astype(out_dtype)
        fused = jnp.concatenate([fused_head, fused_tail], axis=1)
    else:
        fused = fused_head

    # 4) truncate to max_seq_len (same as module).
    if fused.shape[1] > max_seq_len:
        fused = fused[:, :max_seq_len, :]

    # TODO(synk): the fused embeddings would be passed to the Llama LLM
    # (self.llm(inputs_embeds=...)) which is an external pretrained module.
    return fused


# ----------------------------------------------------------------------------
# Pure-JAX reference for correctness checks
# ----------------------------------------------------------------------------
def _reference_forward(af, vf, wa, ba, wv, bv, scale, max_seq_len):
    B, Ta, _ = af.shape
    _, Tv, _ = vf.shape
    N = wa.shape[1]
    a = af @ wa + ba
    v = vf @ wv + bv
    max_len = max(Ta, Tv)
    if Ta < max_len:
        a = jnp.concatenate([a, jnp.zeros((B, max_len - Ta, N), a.dtype)], axis=1)
    if Tv < max_len:
        v = jnp.concatenate([v, jnp.zeros((B, max_len - Tv, N), v.dtype)], axis=1)
    fused = scale * a + (1.0 - scale) * v
    return fused[:, :max_seq_len, :]


if __name__ == "__main__":
    # Small synthetic shapes consistent with the forward pass.
    B = 2
    T_AUDIO = 10          # Whisper encoder frames
    T_VIDEO = 8           # AVHuBERT frames
    WHISPER_DIM = 32      # whisper d_model (small synthetic)
    AVHUBERT_DIM = 48     # avhubert embedding_dim (small synthetic)
    LLM_DIM = 128         # llm input dim (small synthetic)
    FUSION_SCALE = 0.5
    MAX_SEQ_LEN = 256

    key = jax.random.PRNGKey(0)
    k_af, k_vf, k_wa, k_ba, k_wv, k_bv = jax.random.split(key, 6)

    audio_features = jax.random.normal(k_af, (B, T_AUDIO, WHISPER_DIM), jnp.float32)
    video_features = jax.random.normal(k_vf, (B, T_VIDEO, AVHUBERT_DIM), jnp.float32)

    w_audio = 0.02 * jax.random.normal(k_wa, (WHISPER_DIM, LLM_DIM), jnp.float32)
    b_audio = 0.01 * jax.random.normal(k_ba, (LLM_DIM,), jnp.float32)
    w_video = 0.02 * jax.random.normal(k_wv, (AVHUBERT_DIM, LLM_DIM), jnp.float32)
    b_video = 0.01 * jax.random.normal(k_bv, (LLM_DIM,), jnp.float32)

    # Pad/cast params once (load-time), not per forward call.
    audio_params = prepare_linear_params(w_audio, b_audio)
    video_params = prepare_linear_params(w_video, b_video)

    out = avhubert_whisper_forward(
        audio_features, video_features, audio_params, video_params,
        fusion_scale=FUSION_SCALE, max_seq_len=MAX_SEQ_LEN,
    )
    out = jax.block_until_ready(out)

    ref = _reference_forward(
        audio_features, video_features, w_audio, b_audio, w_video, b_video,
        FUSION_SCALE, MAX_SEQ_LEN,
    )
    assert out.shape == ref.shape, (out.shape, ref.shape)
    assert jnp.allclose(out, ref, atol=1e-5, rtol=1e-5)

    # Second check: video longer than audio (exercises the other pad branch).
    out2 = avhubert_whisper_forward(
        video_features @ jnp.zeros((AVHUBERT_DIM, WHISPER_DIM)) + 1.0,  # (B, 8, 32)
        jnp.concatenate([video_features, video_features], axis=1),       # (B, 16, 48)
        audio_params, video_params,
        fusion_scale=0.3, max_seq_len=MAX_SEQ_LEN,
    )
    out2 = jax.block_until_ready(out2)
    ref2 = _reference_forward(
        jnp.ones((B, 8, WHISPER_DIM), jnp.float32),
        jnp.concatenate([video_features, video_features], axis=1),
        w_audio, b_audio, w_video, b_video, 0.3, MAX_SEQ_LEN,
    )
    assert out2.shape == ref2.shape, (out2.shape, ref2.shape)
    assert jnp.allclose(out2, ref2, atol=1e-5, rtol=1e-5)

    print("KERNEL_OK")
</pallas_src>

<mosaic_0001>
module attributes {stable_mosaic.version = 11 : i64} {
  func.func @_linear_kernel(%arg0: i32, %arg1: i32, %arg2: i32, %arg3: memref<24x128xf32, #tpu.memory_space<vmem>>, %arg4: memref<128x128xf32, #tpu.memory_space<vmem>>, %arg5: memref<1x128xf32, #tpu.memory_space<vmem>>, %arg6: memref<24x128xf32, #tpu.memory_space<vmem>>, %arg7: memref<24x128xf32, #tpu.memory_space<vmem>>) attributes {dimension_semantics = [#tpu.dimension_semantics<parallel>, #tpu.dimension_semantics<parallel>, #tpu.dimension_semantics<arbitrary>], iteration_bounds = array<i64: 1, 1, 1>, scalar_prefetch = 0 : i64, scratch_operands = 1 : i64, tpu.core_type = #tpu.core_type<tc>, window_params = [{transform_indices = @transform_0, window_bounds = array<i64: 24, 128>}, {transform_indices = @transform_1, window_bounds = array<i64: 128, 128>}, {transform_indices = @transform_2, window_bounds = array<i64: 1, 128>}, {transform_indices = @transform_3, window_bounds = array<i64: 24, 128>}]} {
    %c0_i32 = arith.constant 0 : i32
    %0 = arith.cmpi eq, %arg2, %c0_i32 : i32
    %1 = arith.extui %0 : i1 to i32
    %c0_i32_0 = arith.constant 0 : i32
    %2 = arith.cmpi ne, %1, %c0_i32_0 : i32
    scf.if %2 {
      %cst_10 = arith.constant 0.000000e+00 : f32
      %12 = vector.broadcast %cst_10 : f32 to vector<24x128xf32>
      %c0_11 = arith.constant 0 : index
      %c0_12 = arith.constant 0 : index
      %13 = vector.load %arg7[%c0_11, %c0_12] : memref<24x128xf32, #tpu.memory_space<vmem>>, vector<24x128xf32>
      tpu.vector_store %arg7[%c0_11, %c0_12], %12 {strides = array<i32>} : memref<24x128xf32, #tpu.memory_space<vmem>>, vector<24x128xf32>,
    } else {
    }
    %c0 = arith.constant 0 : index
    %c0_1 = arith.constant 0 : index
    %3 = vector.load %arg7[%c0, %c0_1] : memref<24x128xf32, #tpu.memory_space<vmem>>, vector<24x128xf32>
    %c0_2 = arith.constant 0 : index
    %c0_3 = arith.constant 0 : index
    %4 = vector.load %arg3[%c0_2, %c0_3] : memref<24x128xf32, #tpu.memory_space<vmem>>, vector<24x128xf32>
    %c0_4 = arith.constant 0 : index
    %c0_5 = arith.constant 0 : index
    %5 = vector.load %arg4[%c0_4, %c0_5] : memref<128x128xf32, #tpu.memory_space<vmem>>, vector<128x128xf32>
    %cst = arith.constant dense<0.000000e+00> : vector<24x128xf32>
    %6 = tpu.matmul %4, %5, %cst {dimension_numbers = #tpu.dot_dimension_numbers<[1], [0], [0], [1], [0, 0, 1, 1], [], []>} : vector<24x128xf32>, vector<128x128xf32>, vector<24x128xf32> -> vector<24x128xf32>
    %7 = arith.addf %3, %6 : vector<24x128xf32>
    %c0_6 = arith.constant 0 : index
    %c0_7 = arith.constant 0 : index
    %8 = vector.load %arg7[%c0_6, %c0_7] : memref<24x128xf32, #tpu.memory_space<vmem>>, vector<24x128xf32>
    tpu.vector_store %arg7[%c0_6, %c0_7], %7 {strides = array<i32>} : memref<24x128xf32, #tpu.memory_space<vmem>>, vector<24x128xf32>,
    %c0_i32_8 = arith.constant 0 : i32
    %9 = arith.cmpi eq, %arg2, %c0_i32_8 : i32
    %10 = arith.extui %9 : i1 to i32
    %c0_i32_9 = arith.constant 0 : i32
    %11 = arith.cmpi ne, %10, %c0_i32_9 : i32
    scf.if %11 {
      %c0_10 = arith.constant 0 : index
      %c0_11 = arith.constant 0 : index
      %12 = vector.load %arg7[%c0_10, %c0_11] : memref<24x128xf32, #tpu.memory_space<vmem>>, vector<24x128xf32>
      %c0_12 = arith.constant 0 : index
      %c0_13 = arith.constant 0 : index
      %13 = vector.load %arg5[%c0_12, %c0_13] : memref<1x128xf32, #tpu.memory_space<vmem>>, vector<1x128xf32>
      %14 = vector.broadcast %13 : vector<1x128xf32> to vector<24x128xf32>
      %15 = arith.addf %12, %14 : vector<24x128xf32>
      %c0_14 = arith.constant 0 : index
      %c0_15 = arith.constant 0 : index
      %16 = vector.load %arg6[%c0_14, %c0_15] : memref<24x128xf32, #tpu.memory_space<vmem>>, vector<24x128xf32>
      tpu.vector_store %arg6[%c0_14, %c0_15], %15 {strides = array<i32>} : memref<24x128xf32, #tpu.memory_space<vmem>>, vector<24x128xf32>,
    } else {
    }
    return
  }
  func.func @transform_0(%arg0: i32, %arg1: i32, %arg2: i32) -> (i32, i32) {
    %c0_i32 = arith.constant 0 : i32
    return %arg0, %arg2 : i32, i32
  }
  func.func @transform_1(%arg0: i32, %arg1: i32, %arg2: i32) -> (i32, i32) {
    %c0_i32 = arith.constant 0 : i32
    return %arg2, %arg1 : i32, i32
  }
  func.func @transform_2(%arg0: i32, %arg1: i32, %arg2: i32) -> (i32, i32) {
    %c0_i32 = arith.constant 0 : i32
    %c0_i32_0 = arith.constant 0 : i32
    return %c0_i32, %arg1 : i32, i32
  }
  func.func @transform_3(%arg0: i32, %arg1: i32, %arg2: i32) -> (i32, i32) {
    %c0_i32 = arith.constant 0 : i32
    return %arg0, %arg1 : i32, i32
  }
}

</mosaic_0001>

<bundles_post_ra>
// kernel: tpu_custom_call.1
= control target key start
LH: loop header
LB: loop body
LE: loop exit
PB: predicated region body
PF: predicated region fallthrough
CT: control target
= control target key end

     0   :  { %8 = vsyncpa [#allocation4], 0  ;;  %s306_s0 = inlined_call_operand.hbm [shape: f32[24,128], index: 0, kind: input, shape index: {}]   ;;  %s307_s1 = inlined_call_operand.hbm [shape: f32[128,128], index: 1, kind: input, shape index: {}]   ;;  %s308_s2 = inlined_call_operand.vmem [shape: f32[1,128], index: 2, kind: input, shape index: {}]   ;;  %s309_s3 = inlined_call_operand.hbm [shape: f32[24,128], index: 3, kind: output, shape index: {}]  }
   0x1   :  { %9 = vsyncpa [#allocation7], 0 }
   0x2   :  { %10 = vsyncpa [#allocation5], 0  ;;  %s15_s14 = sshll.u32 %s306_s0, 4  ;;  %s260_s15 = smov [#allocation3]   ;;  %s16_s14 = int_to_ptr.hbm [resolvable:$true] %s15_s14 }
   0x3   :  { %s17_s16 = sshll.u32 %s260_s15, 4  ;;  %s28_s19 = sshll.u32 %s307_s1, 4  ;;  %s18_s16 = int_to_ptr.vmem [resolvable:$true] %s17_s16  ;;  %s29_s19 = int_to_ptr.hbm [resolvable:$true] %s28_s19 }
   0x4   :  { %s261_s20 = smov 128   ;;  %s262_s21 = smov 8  }
   0x5   :  { %23 = dma.hbm_to_vmem [thread:$0]  %s16_s14, 384, %s18_s16, [#allocation4], %s261_s20, %s261_s20, %s262_s21  }
   0x6   :  { %s263_s22 = smov [#allocation6]  }
   0x7   :  { %s30_s23 = sshll.u32 %s263_s22, 4  ;;  %s31_s23 = int_to_ptr.vmem [resolvable:$true] %s30_s23 }
   0x8   :  { %36 = dma.hbm_to_vmem [thread:$0]  %s29_s19, 2048, %s31_s23, [#allocation7], %s261_s20, %s261_s20, %s262_s21  }
   0x9   :  { %254 = dma.done.wait [#allocation4], 384  }
   0xa   :  { %255 = vsyncadd [#allocation4], 4294966912 }
   0xb   :  { %256 = dma.done.wait [#allocation7], 2048  }
   0xc   :  { %257 = vsyncadd [#allocation7], 4294965248  ;;  %v75_v0 = vld [vmem:[#allocation6 + $0x78] sm:$0xff]  ;;  %v74_v1 = vld [vmem:[#allocation6 + $0x70] sm:$0xff]  ;;  %s264_s24 = smov [#allocation8]   ;;  %s130_s28 = sshll.u32 %s309_s3, 4  ;;  %s131_s28 = int_to_ptr.hbm [resolvable:$true] %s130_s28 }
   0xd   :  { %145 = vmatpush.msra.mxu2 %v75_v0  ;;  %76 = vmatpush.msra.mxu0 %v75_v0  ;;  %v73_v2 = vld [vmem:[#allocation6 + $0x68] sm:$0xff]  ;;  %v72_v3 = vld [vmem:[#allocation6 + $0x60] sm:$0xff]  ;;  %v71_v4 = vld [vmem:[#allocation6 + $0x58] sm:$0xff]  ;;  %s128_s25 = sshll.u32 %s264_s24, 4  ;;  %s129_s25 = int_to_ptr.vmem [resolvable:$true] %s128_s25 }
   0xe   :  { %144 = vmatpush.msra.mxu1 %v75_v0  ;;  %v70_v5 = vld [vmem:[#allocation6 + $0x50] sm:$0xff]  ;;  %v69_v6 = vld [vmem:[#allocation6 + $0x48] sm:$0xff]  ;;  %v68_v7 = vld [vmem:[#allocation6 + $0x40] sm:$0xff] }
   0xf   :  { %147 = vmatpush.msra.mxu2 %v74_v1  ;;  %77 = vmatpush.msra.mxu0 %v74_v1  ;;  %v67_v8 = vld [vmem:[#allocation6 + $0x38] sm:$0xff]  ;;  %v66_v9 = vld [vmem:[#allocation6 + $0x30] sm:$0xff]  ;;  %v65_v10 = vld [vmem:[#allocation6 + $0x28] sm:$0xff] }
  0x10   :  { %146 = vmatpush.msra.mxu1 %v74_v1  ;;  %v64_v11 = vld [vmem:[#allocation6 + $0x20] sm:$0xff]  ;;  %v63_v12 = vld [vmem:[#allocation6 + $0x18] sm:$0xff]  ;;  %v62_v13 = vld [vmem:[#allocation6 + $0x10] sm:$0xff] }
  0x11   :  { %149 = vmatpush.msra.mxu2 %v73_v2  ;;  %78 = vmatpush.msra.mxu0 %v73_v2  ;;  %v61_v14 = vld [vmem:[#allocation6 + $0x8] sm:$0xff]  ;;  %v60_v15 = vld [vmem:[#allocation6] sm:$0xff]  ;;  %v59_v16 = vld [vmem:[#allocation3 + $0x10] sm:$0xff] }
  0x12   :  { %148 = vmatpush.msra.mxu1 %v73_v2  ;;  %v57_v17 = vld [vmem:[#allocation3] sm:$0xff]  ;;  %v58_v18 = vld [vmem:[#allocation3 + $0x8] sm:$0xff] }
  0x13   :  { %151 = vmatpush.msra.mxu2 %v72_v3  ;;  %79 = vmatpush.msra.mxu0 %v72_v3  ;;  %v181_v19 = vld [vmem:[%s308_s2] ss:$0 sm:$0xff] }
  0x14   :  { %150 = vmatpush.msra.mxu1 %v72_v3 }
  0x15   :  { %153 = vmatpush.msra.mxu2 %v71_v4  ;;  %80 = vmatpush.msra.mxu0 %v71_v4 }
  0x16   :  { %152 = vmatpush.msra.mxu1 %v71_v4 }
  0x17   :  { %155 = vmatpush.msra.mxu2 %v70_v5  ;;  %81 = vmatpush.msra.mxu0 %v70_v5 }
  0x18   :  { %154 = vmatpush.msra.mxu1 %v70_v5 }
  0x19   :  { %157 = vmatpush.msra.mxu2 %v69_v6  ;;  %82 = vmatpush.msra.mxu0 %v69_v6 }
  0x1a   :  { %156 = vmatpush.msra.mxu1 %v69_v6 }
  0x1b   :  { %159 = vmatpush.msra.mxu2 %v68_v7  ;;  %83 = vmatpush.msra.mxu0 %v68_v7 }
  0x1c   :  { %158 = vmatpush.msra.mxu1 %v68_v7 }
  0x1d   :  { %161 = vmatpush.msra.mxu2 %v67_v8  ;;  %84 = vmatpush.msra.mxu0 %v67_v8 }
  0x1e   :  { %160 = vmatpush.msra.mxu1 %v67_v8 }
  0x1f   :  { %163 = vmatpush.msra.mxu2 %v66_v9  ;;  %85 = vmatpush.msra.mxu0 %v66_v9 }
  0x20   :  { %162 = vmatpush.msra.mxu1 %v66_v9 }
  0x21   :  { %165 = vmatpush.msra.mxu2 %v65_v10  ;;  %86 = vmatpush.msra.mxu0 %v65_v10 }
  0x22   :  { %164 = vmatpush.msra.mxu1 %v65_v10 }
  0x23   :  { %167 = vmatpush.msra.mxu2 %v64_v11  ;;  %87 = vmatpush.msra.mxu0 %v64_v11 }
  0x24   :  { %166 = vmatpush.msra.mxu1 %v64_v11 }
  0x25   :  { %169 = vmatpush.msra.mxu2 %v63_v12  ;;  %88 = vmatpush.msra.mxu0 %v63_v12 }
  0x26   :  { %168 = vmatpush.msra.mxu1 %v63_v12 }
  0x27   :  { %171 = vmatpush.msra.mxu2 %v62_v13  ;;  %89 = vmatpush.msra.mxu0 %v62_v13 }
  0x28   :  { %170 = vmatpush.msra.mxu1 %v62_v13 }
  0x29   :  { %173 = vmatpush.msra.mxu2 %v61_v14  ;;  %90 = vmatpush.msra.mxu0 %v61_v14 }
  0x2a   :  { %172 = vmatpush.msra.mxu1 %v61_v14 }
  0x2b   :  { %175 = vmatpush.msra.mxu2 %v60_v15  ;;  %91 = vmatpush.msra.mxu0 %v60_v15 }
  0x2c   :  { %98 = vmatmul.f32.vlgmr.msra.gmra.mxu2 %v59_v16  ;;  %174 = vmatpush.msra.mxu1 %v60_v15 }
  0x2d   :  { %92 = vmatmul.f32.vlgmr.msra.gmra.mxu0 %v57_v17  ;;  %95 = vmatmul.f32.vlgmr.msra.gmra.mxu1 %v58_v18 }
  0xaa   :  { %v93_v20 = vpop.f32.mrf.mxu0  ;;  %v96_v21 = vpop.f32.mrf.mxu1 }
  0xab   :  { %v118_v22 = vadd.f32 %v181_v19, %v93_v20  ;;  %v119_v23 = vadd.f32 %v181_v19, %v96_v21 }
  0xad   :  { %121 = vst [vmem:[#allocation8] sm:$0xff] %v118_v22 }
  0xae   :  { %122 = vst [vmem:[#allocation8 + $0x8] sm:$0xff] %v119_v23 }
  0xaf   :  { %v99_v24 = vpop.f32.mrf.mxu2 }
  0xb0   :  { %v120_v25 = vadd.f32 %v181_v19, %v99_v24 }
  0xb2   :  { %123 = vst [vmem:[#allocation8 + $0x10] sm:$0xff] %v120_v25 }
  0xb3   :  { %136 = dma.vmem_to_hbm [thread:$0]  %s129_s25, 384, %s131_s28, [#allocation5], %s261_s20, %s261_s20, %s262_s21  }
  0xb4   :  { %258 = dma.done.wait [#allocation5], 384  }
  0xb5   :  { %259 = vsyncadd [#allocation5], 4294966912 }
  0xb6   :  { %141 = vsyncpa [#allocation4], 1 }
  0xb7   :  { %142 = vsyncpa [#allocation7], 1 }
  0xb8   :  { %143 = vsyncpa [#allocation5], 1 }

</bundles_post_ra>
